<compile_context>
chip_gen: v5e
topology: v5e:2x2
jax: 0.10.0
libtpu: 0.0.40
codegen_flags: <defaults>
</compile_context>

<pallas_src>
import numpy as np
import jax
import jax.numpy as jnp
from jax.experimental import pallas as pl
from jax.experimental.pallas import tpu as pltpu

LANE = 128                           # vreg lane width (last block dim -> lanes)
TARGET_BLOCK_BYTES = 4 * 1024 * 1024  # ~4 MiB per grid step (per the review)
VMEM_LIMIT_BYTES = 32 * 1024 * 1024   # 4 x 4 MiB blocks + headroom; safe on all gens


def _copy_kernel(x_ref, o_ref):
    o_ref[...] = x_ref[...]


def _call_copy(x2d, tm, grid_rows, total_bytes):
    rows, cols = x2d.shape
    return pl.pallas_call(
        _copy_kernel,
        out_shape=jax.ShapeDtypeStruct((rows, cols), x2d.dtype),
        grid=(grid_rows,),
        in_specs=[pl.BlockSpec((tm, cols), lambda i: (i, 0))],
        out_specs=pl.BlockSpec((tm, cols), lambda i: (i, 0)),
        input_output_aliases={0: 0},          # reuse the input HBM buffer
        compiler_params=pltpu.CompilerParams(
            dimension_semantics=("parallel",),
            vmem_limit_bytes=VMEM_LIMIT_BYTES),
        cost_estimate=pl.CostEstimate(
            flops=0, transcendentals=0, bytes_accessed=2 * total_bytes),
    )(x2d)


def identity_pallas(x):
    """Identity.forward(x): returns a tensor numerically equal to x."""
    orig_shape = x.shape
    n = x.size
    if n == 0:
        return x                      # nothing to move; avoid a zero-size grid

    itemsize = jnp.dtype(x.dtype).itemsize
    total_bytes = n * itemsize

    if n % LANE == 0:
        rows = n // LANE
        # Block rows sized for ~TARGET_BLOCK_BYTES, rounded down to a multiple
        # of 8 (sublane alignment); full-extent blocks are always legal.
        target_rows = max(8, (TARGET_BLOCK_BYTES // (LANE * itemsize)) // 8 * 8)
        if rows <= target_rows:
            tm, grid_rows = rows, 1           # single full-extent block
        else:
            tm = target_rows                   # multiple of 8 -> legal block
            grid_rows = pl.cdiv(rows, tm)      # ragged tail handled by masking

        x2d = x.reshape(rows, LANE)            # lane-dense 2-D view (free)
        # Only donate a buffer we created here (reshape of same shape is a
        # no-op in JAX and would alias/donate the caller's array).
        if x2d is x:
            x2d = x.reshape(rows, LANE) + jnp.zeros((), x.dtype)  # defensive copy
        out2d = _call_copy(x2d, tm, grid_rows, total_bytes)
        return out2d.reshape(orig_shape)

    # Ragged fallback (numel not a multiple of 128): single full-extent block.
    # TODO(synk): for huge ragged tensors, tile and pass the true element
    # count via scalar prefetch + masked store on the last block instead.
    x2d = x.reshape(1, n)
    out2d = _call_copy(x2d, 1, 1, total_bytes)
    return out2d.reshape(orig_shape)


if __name__ == "__main__":
    key = jax.random.PRNGKey(0)
    N, C, H, W = 2, 4, 16, 16
    x = jax.random.normal(key, (N, C, H, W), jnp.float32)   # PyTorch NCHW input

    y = identity_pallas(x)
    y = jax.block_until_ready(y)

    assert y.shape == x.shape and y.dtype == x.dtype
    np.testing.assert_array_equal(np.asarray(y), np.asarray(x))
    print("KERNEL_OK")
</pallas_src>

<mosaic_0001>
module attributes {stable_mosaic.version = 11 : i64} {
  func.func @_copy_kernel(%arg0: i32, %arg1: memref<16x128xf32, #tpu.memory_space<vmem>>, %arg2: memref<16x128xf32, #tpu.memory_space<vmem>>) attributes {dimension_semantics = [#tpu.dimension_semantics<parallel>], iteration_bounds = array<i64: 1>, scalar_prefetch = 0 : i64, scratch_operands = 0 : i64, tpu.core_type = #tpu.core_type<tc>, window_params = [{transform_indices = @transform_0, window_bounds = array<i64: 16, 128>}, {transform_indices = @transform_1, window_bounds = array<i64: 16, 128>}]} {
    %c0 = arith.constant 0 : index
    %c0_0 = arith.constant 0 : index
    %0 = vector.load %arg1[%c0, %c0_0] : memref<16x128xf32, #tpu.memory_space<vmem>>, vector<16x128xf32>
    %c0_1 = arith.constant 0 : index
    %c0_2 = arith.constant 0 : index
    %1 = vector.load %arg2[%c0_1, %c0_2] : memref<16x128xf32, #tpu.memory_space<vmem>>, vector<16x128xf32>
    tpu.vector_store %arg2[%c0_1, %c0_2], %0 {strides = array<i32>} : memref<16x128xf32, #tpu.memory_space<vmem>>, vector<16x128xf32>,
    return
  }
  func.func @transform_0(%arg0: i32) -> (i32, i32) {
    %c0_i32 = arith.constant 0 : i32
    %c0_i32_0 = arith.constant 0 : i32
    return %arg0, %c0_i32 : i32, i32
  }
  func.func @transform_1(%arg0: i32) -> (i32, i32) {
    %c0_i32 = arith.constant 0 : i32
    %c0_i32_0 = arith.constant 0 : i32
    return %arg0, %c0_i32 : i32, i32
  }
}

</mosaic_0001>

<bundles_post_ra>
// kernel: tpu_custom_call.1
= control target key start
LH: loop header
LB: loop body
LE: loop exit
PB: predicated region body
PF: predicated region fallthrough
CT: control target
= control target key end

     0   :  { %6 = vsyncpa [#allocation3], 0  ;;  %s124_s0 = inlined_call_operand.hbm [shape: f32[16,128], index: 0, kind: input, shape index: {}, may-alias: {0,1}]   ;;  %s125_s1 = inlined_call_operand.hbm [shape: f32[16,128], index: 1, kind: output, shape index: {}, may-alias: {0,1}]  }
   0x1   :  { %7 = vsyncpa [#allocation4], 0  ;;  %s12_s8 = sshll.u32 %s124_s0, 4  ;;  %s104_s9 = smov [#allocation2]   ;;  %s13_s8 = int_to_ptr.hbm [resolvable:$true] %s12_s8 }
   0x2   :  { %s14_s10 = sshll.u32 %s104_s9, 4  ;;  %s105_s11 = smov 128   ;;  %s15_s10 = int_to_ptr.vmem [resolvable:$true] %s14_s10 }
   0x3   :  { %s106_s12 = smov 8  }
   0x4   :  { %20 = dma.hbm_to_vmem [thread:$0]  %s13_s8, 256, %s15_s10, [#allocation3], %s105_s11, %s105_s11, %s106_s12  }
   0x5   :  { %100 = dma.done.wait [#allocation3], 256  }
   0x6   :  { %101 = vsyncadd [#allocation3], 4294967040  ;;  %s107_s13 = smov [#allocation5]   ;;  %s35_s17 = sshll.u32 %s125_s1, 4  ;;  %v25_v0 = vld [vmem:[#allocation2] sm:$0xff]  ;;  %v26_v1 = vld [vmem:[#allocation2 + $0x8] sm:$0xff]  ;;  %s36_s17 = int_to_ptr.hbm [resolvable:$true] %s35_s17 }
   0x7   :  { %s33_s14 = sshll.u32 %s107_s13, 4  ;;  %27 = vst [vmem:[#allocation5] sm:$0xff] %v25_v0  ;;  %s34_s14 = int_to_ptr.vmem [resolvable:$true] %s33_s14 }
   0x8   :  { %28 = vst [vmem:[#allocation5 + $0x8] sm:$0xff] %v26_v1 }
   0x9   :  { %41 = dma.vmem_to_hbm [thread:$0]  %s34_s14, 256, %s36_s17, [#allocation4], %s105_s11, %s105_s11, %s106_s12  }
   0xa   :  { %102 = dma.done.wait [#allocation4], 256  }
   0xb   :  { %103 = vsyncadd [#allocation4], 4294967040 }
   0xc   :  { %46 = vsyncpa [#allocation3], 1 }
   0xd   :  { %47 = vsyncpa [#allocation4], 1 }

</bundles_post_ra>
